<compile_context>
chip_gen: v5e
topology: v5e:2x2
jax: 0.10.0
libtpu: 0.0.40
codegen_flags: <defaults>
</compile_context>

<pallas_src>
import functools

import jax
import jax.numpy as jnp
import numpy as np
from jax import lax
from jax.experimental import pallas as pl
from jax.experimental.pallas import tpu as pltpu


def _round_up(v, m):
    return (v + m - 1) // m * m


def _res_gated_kernel(x_ref, src_ref, dst_ref, w_ref, out_ref, kqvs_ref, *,
                      nout_p):
    n_nodes = x_ref.shape[0]
    te = src_ref.shape[-1]

    # ---- grid step 0: fused projection (K+bk | Q+bq | V+bv | S+bias) ----------
    @pl.when(pl.program_id(0) == 0)
    def _init():
        kqvs = jnp.dot(x_ref[...], w_ref[...],
                       preferred_element_type=jnp.float32)
        kqvs_ref[...] = kqvs                    # persistent VMEM scratch
        # out starts as the skip connection S plus the final bias (already folded
        # into the last weight-slab column block); edge messages accumulate below.
        out_ref[...] = kqvs[:, 3 * nout_p:]

    # ---- every grid step: one tile of TE edges ---------------------------------
    src = src_ref[0]                            # (1, TE) int32 source j
    dst = dst_ref[0]                            # (1, TE) int32 dest   i
    row = lax.broadcasted_iota(jnp.int32, (n_nodes, te), 0)
    g_src_t = (row == src).astype(jnp.float32)  # (N, TE) = one_hot(src)^T
    g_dst_t = (row == dst).astype(jnp.float32)  # (N, TE) = one_hot(dst)^T
    # (padded / out-of-range indices match no row -> contribute nothing)

    # Gather Q[src]|V[src] with one matmul and K[dst] with a second; contraction
    # is over the node axis (dim 0 of both operands) so no explicit transpose is
    # ever materialized.
    dn = (((0,), (0,)), ((), ()))
    qv_j = lax.dot_general(g_src_t, kqvs_ref[:, nout_p:3 * nout_p], dn,
                           preferred_element_type=jnp.float32)   # (TE, 2*nout_p)
    k_i = lax.dot_general(g_dst_t, kqvs_ref[:, :nout_p], dn,
                          preferred_element_type=jnp.float32)    # (TE, nout_p)

    eta = jax.nn.sigmoid(k_i + qv_j[:, :nout_p])                 # gate per edge
    msg = eta * qv_j[:, nout_p:]                                  # (TE, nout_p)

    # Scatter-add onto destination nodes: (N, TE) @ (TE, nout_p) matmul,
    # accumulated into the resident output block.
    out_ref[...] += jnp.dot(g_dst_t, msg, preferred_element_type=jnp.float32)


def res_gated_graph_conv(x, edge_index, edge_attr, params, *, edge_tile=128):
    """x: (N, nin) f32, edge_index: (2, E) int (row0 = src j, row1 = dst i)."""
    del edge_attr  # the module's forward ignores edge_attr
    n, nin = x.shape
    nout = params["wk"].shape[0]
    e = edge_index.shape[1]

    f32 = jnp.float32
    n_p = _round_up(max(n, 8), 8)                  # sublane-friendly node count
    nout_p = _round_up(max(nout, 128), 128)        # lane-dense feature width
    edge_tile = max(128, min(edge_tile, _round_up(e, 128)))  # clip padding waste
    e_p = _round_up(max(e, edge_tile), edge_tile)
    n_tiles = e_p // edge_tile

    # ---- host-side packing ------------------------------------------------------
    # Augment x with a ones-column so biases ride inside the fused matmul.
    x_p = jnp.zeros((n_p, nin + 1), f32)
    x_p = x_p.at[:n, :nin].set(x.astype(f32))
    x_p = x_p.at[:n, nin].set(1.0)

    def w_cols(w, b):
        """PyTorch layout (nout, nin) + bias -> (nin+1, nout_p), zero padded."""
        col = jnp.zeros((nin + 1, nout_p), f32)
        col = col.at[:nin, :nout].set(w.T.astype(f32))
        if b is not None:
            col = col.at[nin, :nout].set(b.astype(f32))
        return col

    # Fused weight slab: columns are [K+bk | Q+bq | V+bv | S+bias], each nout_p wide.
    w_fused = jnp.concatenate(
        [w_cols(params["wk"], params["bk"]),
         w_cols(params["wq"], params["bq"]),
         w_cols(params["wv"], params["bv"]),
         w_cols(params["ws"], params["bias"])], axis=1)

    # Lane-major edge-index tiles; padded edges use -1 (never matches a node).
    pad_idx = jnp.full((e_p,), -1, jnp.int32)
    src = pad_idx.at[:e].set(edge_index[0].astype(jnp.int32)).reshape(
        n_tiles, 1, edge_tile)
    dst = pad_idx.at[:e].set(edge_index[1].astype(jnp.int32)).reshape(
        n_tiles, 1, edge_tile)

    # ---- VMEM budget hint (bytes, f32) --------------------------------------------
    est = 4 * (n_p * (nin + 1)               # x (augmented)
               + (nin + 1) * 4 * nout_p      # fused W
               + 4 * edge_tile * 2 * 2       # src/dst tiles (double-buffered)
               + n_p * nout_p                # resident output accumulator
               + n_p * 4 * nout_p            # K|Q|V|S scratch
               + 2 * n_p * edge_tile         # two one-hot tiles
               + edge_tile * 4 * nout_p)     # qv_j, k_i, msg
    vmem_limit = int(min(max(2 * est, 8 * 1024 * 1024), 48 * 1024 * 1024))

    kernel = functools.partial(_res_gated_kernel, nout_p=nout_p)
    out_p = pl.pallas_call(
        kernel,
        out_shape=jax.ShapeDtypeStruct((n_p, nout_p), f32),
        grid=(n_tiles,),
        in_specs=[
            pl.BlockSpec((n_p, nin + 1), lambda t: (0, 0)),              # x (aug)
            pl.BlockSpec((1, 1, edge_tile), lambda t: (t, 0, 0)),        # src tile
            pl.BlockSpec((1, 1, edge_tile), lambda t: (t, 0, 0)),        # dst tile
            pl.BlockSpec((nin + 1, 4 * nout_p), lambda t: (0, 0)),       # W fused
        ],
        out_specs=pl.BlockSpec((n_p, nout_p), lambda t: (0, 0)),
        scratch_shapes=[pltpu.VMEM((n_p, 4 * nout_p), f32)],
        compiler_params=pltpu.CompilerParams(
            dimension_semantics=("arbitrary",),   # output accumulates across tiles
            vmem_limit_bytes=vmem_limit,
        ),
    )(x_p, src, dst, w_fused)

    return out_p[:n, :nout]


def _reference(x, edge_index, params):
    """Pure-JAX reference mirroring torch_geometric.nn.ResGatedGraphConv."""
    k = x @ params["wk"].T + params["bk"]
    q = x @ params["wq"].T + params["bq"]
    v = x @ params["wv"].T + params["bv"]
    s = x @ params["ws"].T
    src, dst = edge_index[0], edge_index[1]
    eta = jax.nn.sigmoid(k[dst] + q[src])
    msg = eta * v[src]
    agg = jax.ops.segment_sum(msg, dst, num_segments=x.shape[0])
    return s + agg + params["bias"]


if __name__ == "__main__":
    nin, nout = 8, 16
    n_nodes, n_edges = 16, 32

    key = jax.random.PRNGKey(0)
    keys = jax.random.split(key, 12)

    x = jax.random.normal(keys[0], (n_nodes, nin), dtype=jnp.float32)
    edge_index = jax.random.randint(keys[1], (2, n_edges), 0, n_nodes,
                                    dtype=jnp.int32)
    edge_attr = jax.random.normal(keys[2], (n_edges, 4), dtype=jnp.float32)  # ignored

    scale = 1.0 / np.sqrt(nin)
    params = {
        "wk": jax.random.normal(keys[3], (nout, nin), jnp.float32) * scale,
        "wq": jax.random.normal(keys[4], (nout, nin), jnp.float32) * scale,
        "wv": jax.random.normal(keys[5], (nout, nin), jnp.float32) * scale,
        "ws": jax.random.normal(keys[6], (nout, nin), jnp.float32) * scale,
        "bk": jax.random.normal(keys[7], (nout,), jnp.float32) * scale,
        "bq": jax.random.normal(keys[8], (nout,), jnp.float32) * scale,
        "bv": jax.random.normal(keys[9], (nout,), jnp.float32) * scale,
        "bias": jax.random.normal(keys[10], (nout,), jnp.float32) * scale,
    }

    out = res_gated_graph_conv(x, edge_index, edge_attr, params)
    out = jax.block_until_ready(out)

    ref = jax.block_until_ready(_reference(x, edge_index, params))
    np.testing.assert_allclose(np.asarray(out), np.asarray(ref),
                               rtol=1e-4, atol=1e-4)

    print("KERNEL_OK")
</pallas_src>

<mosaic_0001>
module attributes {stable_mosaic.version = 11 : i64} {
  func.func @_res_gated_kernel(%arg0: i32, %arg1: memref<16x9xf32, #tpu.memory_space<vmem>>, %arg2: memref<1x1x128xi32, #tpu.memory_space<vmem>>, %arg3: memref<1x1x128xi32, #tpu.memory_space<vmem>>, %arg4: memref<9x512xf32, #tpu.memory_space<vmem>>, %arg5: memref<16x128xf32, #tpu.memory_space<vmem>>, %arg6: memref<16x512xf32, #tpu.memory_space<vmem>>) attributes {dimension_semantics = [#tpu.dimension_semantics<arbitrary>], iteration_bounds = array<i64: 1>, scalar_prefetch = 0 : i64, scratch_operands = 1 : i64, tpu.core_type = #tpu.core_type<tc>, window_params = [{pipeline_mode = #tpu.pipeline_mode<synchronous>, transform_indices = @transform_0, window_bounds = array<i64: 16, 9>}, {transform_indices = @transform_1, window_bounds = array<i64: 1, 1, 128>}, {transform_indices = @transform_2, window_bounds = array<i64: 1, 1, 128>}, {pipeline_mode = #tpu.pipeline_mode<synchronous>, transform_indices = @transform_3, window_bounds = array<i64: 9, 512>}, {pipeline_mode = #tpu.pipeline_mode<synchronous>, transform_indices = @transform_4, window_bounds = array<i64: 16, 128>}]} {
    %c0_i32 = arith.constant 0 : i32
    %0 = arith.cmpi eq, %arg0, %c0_i32 : i32
    %1 = arith.extui %0 : i1 to i32
    %c0_i32_0 = arith.constant 0 : i32
    %2 = arith.cmpi ne, %1, %c0_i32_0 : i32
    scf.if %2 {
      %c0_16 = arith.constant 0 : index
      %c0_17 = arith.constant 0 : index
      %33 = vector.load %arg1[%c0_16, %c0_17] : memref<16x9xf32, #tpu.memory_space<vmem>>, vector<16x9xf32>
      %c0_18 = arith.constant 0 : index
      %c0_19 = arith.constant 0 : index
      %34 = vector.load %arg4[%c0_18, %c0_19] : memref<9x512xf32, #tpu.memory_space<vmem>>, vector<9x512xf32>
      %cst_20 = arith.constant dense<0.000000e+00> : vector<16x512xf32>
      %35 = tpu.matmul %33, %34, %cst_20 {dimension_numbers = #tpu.dot_dimension_numbers<[1], [0], [0], [1], [0, 0, 1, 1], [], []>} : vector<16x9xf32>, vector<9x512xf32>, vector<16x512xf32> -> vector<16x512xf32>
      %c0_21 = arith.constant 0 : index
      %c0_22 = arith.constant 0 : index
      %36 = vector.load %arg6[%c0_21, %c0_22] : memref<16x512xf32, #tpu.memory_space<vmem>>, vector<16x512xf32>
      tpu.vector_store %arg6[%c0_21, %c0_22], %35 {strides = array<i32>} : memref<16x512xf32, #tpu.memory_space<vmem>>, vector<16x512xf32>,
      %37 = vector.extract_strided_slice %35 {offsets = [0, 384], sizes = [16, 128], strides = [1, 1]} : vector<16x512xf32> to vector<16x128xf32>
      %c0_23 = arith.constant 0 : index
      %c0_24 = arith.constant 0 : index
      %38 = vector.load %arg5[%c0_23, %c0_24] : memref<16x128xf32, #tpu.memory_space<vmem>>, vector<16x128xf32>
      tpu.vector_store %arg5[%c0_23, %c0_24], %37 {strides = array<i32>} : memref<16x128xf32, #tpu.memory_space<vmem>>, vector<16x128xf32>,
    } else {
    }
    %c0 = arith.constant 0 : index
    %c0_1 = arith.constant 0 : index
    %c0_2 = arith.constant 0 : index
    %3 = vector.load %arg2[%c0, %c0_1, %c0_2] : memref<1x1x128xi32, #tpu.memory_space<vmem>>, vector<1x1x128xi32>
    %4 = vector.shape_cast %3 : vector<1x1x128xi32> to vector<1x128xi32>
    %c0_3 = arith.constant 0 : index
    %c0_4 = arith.constant 0 : index
    %c0_5 = arith.constant 0 : index
    %5 = vector.load %arg3[%c0_3, %c0_4, %c0_5] : memref<1x1x128xi32, #tpu.memory_space<vmem>>, vector<1x1x128xi32>
    %6 = vector.shape_cast %5 : vector<1x1x128xi32> to vector<1x128xi32>
    %7 = tpu.iota {dimensions = array<i32: 0>} : vector<16x128xi32>
    %8 = vector.broadcast %4 : vector<1x128xi32> to vector<16x128xi32>
    %9 = arith.cmpi eq, %7, %8 : vector<16x128xi32>
    %10 = arith.extui %9 : vector<16x128xi1> to vector<16x128xi32>
    %11 = arith.sitofp %10 : vector<16x128xi32> to vector<16x128xf32>
    %12 = vector.broadcast %6 : vector<1x128xi32> to vector<16x128xi32>
    %13 = arith.cmpi eq, %7, %12 : vector<16x128xi32>
    %14 = arith.extui %13 : vector<16x128xi1> to vector<16x128xi32>
    %15 = arith.sitofp %14 : vector<16x128xi32> to vector<16x128xf32>
    %c0_6 = arith.constant 0 : index
    %c128 = arith.constant 128 : index
    %16 = vector.load %arg6[%c0_6, %c128] : memref<16x512xf32, #tpu.memory_space<vmem>>, vector<16x256xf32>
    %cst = arith.constant dense<0.000000e+00> : vector<128x256xf32>
    %17 = tpu.matmul %11, %16, %cst {dimension_numbers = #tpu.dot_dimension_numbers<[0], [0], [1], [1], [0, 1, 1, 1], [], []>} : vector<16x128xf32>, vector<16x256xf32>, vector<128x256xf32> -> vector<128x256xf32>
    %c0_7 = arith.constant 0 : index
    %c0_8 = arith.constant 0 : index
    %18 = vector.load %arg6[%c0_7, %c0_8] : memref<16x512xf32, #tpu.memory_space<vmem>>, vector<16x128xf32>
    %cst_9 = arith.constant dense<0.000000e+00> : vector<128x128xf32>
    %19 = tpu.matmul %15, %18, %cst_9 {dimension_numbers = #tpu.dot_dimension_numbers<[0], [0], [1], [1], [0, 1, 1, 1], [], []>} : vector<16x128xf32>, vector<16x128xf32>, vector<128x128xf32> -> vector<128x128xf32>
    %20 = vector.extract_strided_slice %17 {offsets = [0, 0], sizes = [128, 128], strides = [1, 1]} : vector<128x256xf32> to vector<128x128xf32>
    %21 = arith.addf %19, %20 : vector<128x128xf32>
    %22 = arith.negf %21 : vector<128x128xf32>
    %23 = math.exp %22 : vector<128x128xf32>
    %cst_10 = arith.constant 1.000000e+00 : f32
    %24 = vector.broadcast %cst_10 : f32 to vector<128x128xf32>
    %25 = arith.addf %24, %23 : vector<128x128xf32>
    %26 = arith.divf %24, %25 : vector<128x128xf32>
    %27 = vector.extract_strided_slice %17 {offsets = [0, 128], sizes = [128, 128], strides = [1, 1]} : vector<128x256xf32> to vector<128x128xf32>
    %28 = arith.mulf %26, %27 : vector<128x128xf32>
    %c0_11 = arith.constant 0 : index
    %c0_12 = arith.constant 0 : index
    %29 = vector.load %arg5[%c0_11, %c0_12] : memref<16x128xf32, #tpu.memory_space<vmem>>, vector<16x128xf32>
    %cst_13 = arith.constant dense<0.000000e+00> : vector<16x128xf32>
    %30 = tpu.matmul %15, %28, %cst_13 {dimension_numbers = #tpu.dot_dimension_numbers<[1], [0], [0], [1], [0, 0, 1, 1], [], []>} : vector<16x128xf32>, vector<128x128xf32>, vector<16x128xf32> -> vector<16x128xf32>
    %31 = arith.addf %29, %30 : vector<16x128xf32>
    %c0_14 = arith.constant 0 : index
    %c0_15 = arith.constant 0 : index
    %32 = vector.load %arg5[%c0_14, %c0_15] : memref<16x128xf32, #tpu.memory_space<vmem>>, vector<16x128xf32>
    tpu.vector_store %arg5[%c0_14, %c0_15], %31 {strides = array<i32>} : memref<16x128xf32, #tpu.memory_space<vmem>>, vector<16x128xf32>,
    return
  }
  func.func @transform_0(%arg0: i32) -> (i32, i32) {
    %c0_i32 = arith.constant 0 : i32
    %c0_i32_0 = arith.constant 0 : i32
    %c0_i32_1 = arith.constant 0 : i32
    return %c0_i32, %c0_i32_0 : i32, i32
  }
  func.func @transform_1(%arg0: i32) -> (i32, i32, i32) {
    %c0_i32 = arith.constant 0 : i32
    %c0_i32_0 = arith.constant 0 : i32
    %c0_i32_1 = arith.constant 0 : i32
    return %arg0, %c0_i32, %c0_i32_0 : i32, i32, i32
  }
  func.func @transform_2(%arg0: i32) -> (i32, i32, i32) {
    %c0_i32 = arith.constant 0 : i32
    %c0_i32_0 = arith.constant 0 : i32
    %c0_i32_1 = arith.constant 0 : i32
    return %arg0, %c0_i32, %c0_i32_0 : i32, i32, i32
  }
  func.func @transform_3(%arg0: i32) -> (i32, i32) {
    %c0_i32 = arith.constant 0 : i32
    %c0_i32_0 = arith.constant 0 : i32
    %c0_i32_1 = arith.constant 0 : i32
    return %c0_i32, %c0_i32_0 : i32, i32
  }
  func.func @transform_4(%arg0: i32) -> (i32, i32) {
    %c0_i32 = arith.constant 0 : i32
    %c0_i32_0 = arith.constant 0 : i32
    %c0_i32_1 = arith.constant 0 : i32
    return %c0_i32, %c0_i32_0 : i32, i32
  }
}

</mosaic_0001>

<bundles_post_ra>
// kernel: tpu_custom_call.1
= control target key start
LH: loop header
LB: loop body
LE: loop exit
PB: predicated region body
PF: predicated region fallthrough
CT: control target
= control target key end

     0   :  { %9 = vsyncpa [#allocation4], 0  ;;  %s1642_s0 = inlined_call_operand.hbm [shape: f32[16,9], index: 0, kind: input, shape index: {}]   ;;  %s1643_s1 = inlined_call_operand.hbm [shape: s32[1,1,128], index: 1, kind: input, shape index: {}]   ;;  %s1644_s2 = inlined_call_operand.vmem [shape: s32[1,1,128], index: 2, kind: input, shape index: {}]   ;;  %s1645_s3 = inlined_call_operand.hbm [shape: f32[9,512], index: 3, kind: input, shape index: {}]   ;;  %s1646_s4 = inlined_call_operand.hbm [shape: f32[16,128], index: 4, kind: output, shape index: {}]  }
   0x1   :  { %10 = vsyncpa [#allocation7], 0  ;;  %s30_s17 = sshll.u32 %s1643_s1, 4  ;;  %s31_s17 = int_to_ptr.hbm [resolvable:$true] %s30_s17 }
   0x2   :  { %11 = vsyncpa [#allocation5], 0  ;;  %s1293_s18 = smov [#allocation6]   ;;  %s16_s22 = sshll.u32 %s1642_s0, 4  ;;  %s17_s22 = int_to_ptr.hbm [resolvable:$true] %s16_s22 }
   0x3   :  { %s32_s19 = sshll.u32 %s1293_s18, 4  ;;  %s1294_s23 = smov [#allocation3]   ;;  %s33_s19 = int_to_ptr.vmem [resolvable:$true] %s32_s19 }
   0x4   :  { %35 = dma.hbm_to_vmem [thread:$0]  %s31_s17, 16, %s33_s19, [#allocation7]  }
   0x5   :  { %s18_s24 = sshll.u32 %s1294_s23, 4  ;;  %s1295_s25 = smov 128   ;;  %s19_s24 = int_to_ptr.vmem [resolvable:$true] %s18_s24 }
   0x6   :  { %s1296_s26 = smov 8   ;;  %s42_s28 = sshll.u32 %s1645_s3, 4  ;;  %s43_s28 = int_to_ptr.hbm [resolvable:$true] %s42_s28 }
   0x7   :  { %24 = dma.hbm_to_vmem [thread:$0]  %s17_s22, 256, %s19_s24, [#allocation4], %s1295_s25, %s1295_s25, %s1296_s26  }
   0x8   :  { %s1297_s29 = smov [#allocation8]   ;;  %s1298_s0 = smov 512  }
   0x9   :  { %s44_s30 = sshll.u32 %s1297_s29, 4  ;;  %s1299_s5 = smov 32   ;;  %s45_s30 = int_to_ptr.vmem [resolvable:$true] %s44_s30 }
   0xa   :  { %50 = dma.hbm_to_vmem [thread:$0]  %s43_s28, 1024, %s45_s30, [#allocation7], %s1298_s0, %s1298_s0, %s1299_s5  }
   0xb   :  { %1287 = dma.done.wait [#allocation4], 256  }
   0xc   :  { %1288 = vsyncadd [#allocation4], 4294967040 }
   0xd   :  { %1289 = dma.done.wait [#allocation7], 1040  }
   0xe   :  { %1290 = vsyncadd [#allocation7], 4294966256  ;;  %v201_v0 = vlaneseq  ;;  %vm84_vm0 = vcmask 1040384   ;;  %v73_v2 = vld [vmem:[#allocation8 + $0x20] sm:$0x1]  ;;  %v1342_v4 = vld [vmem:[#allocation3] sm:$0xff] }
   0xf   :  { %v69_v3 = vld [vmem:[#allocation8] sm:$0xff]  ;;  %vm77_vm1 = vcmask 72704   ;;  %949 = vmatpush.msk.msra.mxu3 %vm84_vm0, %v73_v2  ;;  %v1125_v5 = vld [vmem:[#allocation6] ss:$0 sm:$0xff]  ;;  %v1348_v6 = vld [vmem:[%s1644_s2] ss:$0 sm:$0xff] }
  0x10   :  { %v1340_v1 = vshrl.u32 %v201_v0, 7  ;;  %v74_v8 = vld [vmem:[#allocation8 + $0x28] sm:$0x1]  ;;  %v1300_v9 = vmov 0.0   ;;  %v75_v13 = vld [vmem:[#allocation8 + $0x30] sm:$0x1] }
  0x11   :  { %112 = vmatpush.msra.mxu3 %v69_v3  ;;  %v70_v11 = vld [vmem:[#allocation8 + $0x8] sm:$0xff]  ;;  %v71_v15 = vld [vmem:[#allocation8 + $0x10] sm:$0xff]  ;;  %vm254_vm6 = vcmask 130048   ;;  %s1302_s2 = smov [#allocation9]   ;;  %s935_s10 = sshll.u32 %s1646_s4, 4  ;;  %s936_s10 = int_to_ptr.hbm [resolvable:$true] %s935_s10 }
  0x12   :  { %v1351_v7 = vadd.s32 8, %v1340_v1  ;;  %vm205_vm2 = vcmp.eq.s32.totalorder %v1340_v1, %v1125_v5  ;;  %950 = vmatmul.msk.f32.vlgmr.msra.gmra.mxu3 %vm77_vm1, %v1342_v4  ;;  %vm1648_vm3 = vcmp.eq.s32.totalorder %v1340_v1, %v1348_v6  ;;  %v1366_v16 = vld [vmem:[#allocation3 + $0x8] sm:$0xff]  ;;  %s933_s7 = sshll.u32 %s1302_s2, 4  ;;  %s934_s7 = int_to_ptr.vmem [resolvable:$true] %s933_s7 }
  0x13   :  { %v961_v10 = vsel %vm205_vm2, 1.0, %v1300_v9  ;;  %v963_v12 = vsel %vm1648_vm3, 1.0, %v1300_v9  ;;  %952 = vmatpush.msk.msrb.mxu3 %vm84_vm0, %v74_v8 }
  0x14   :  { %v1041_v14 = vpack.i.bf16 %v961_v10, %v963_v12  ;;  %vm206_vm4 = vcmp.eq.s32.totalorder %v1351_v7, %v1125_v5  ;;  %vm1647_vm5 = vcmp.eq.s32.totalorder %v1351_v7, %v1348_v6 }
  0x15   :  { %135 = vmatpush.msrb.mxu3 %v70_v11  ;;  %v962_v17 = vsel %vm206_vm4, 1.0, %v1300_v9  ;;  %v964_v18 = vsel %vm1647_vm5, 1.0, %v1300_v9 }
  0x16   :  { %1042 = vxpose.xlu0.b32.start [1/2] (short) %v1041_v14, 128  ;;  %v1043_v19 = vpack.i.bf16 %v962_v17, %v964_v18 }
  0x17   :  { %955 = vmatpush.msk.msra.mxu3 %vm84_vm0, %v75_v13 }
  0x19   :  { %158 = vmatpush.msra.mxu3 %v71_v15 }
  0x1a   :  { %951 = vmatmul.msk.f32.gmra.mxu3 %vm77_vm1, %v1366_v16 }
  0x1e   :  { %1044 = vxpose.xlu0.b32.end [2/2] (short) %v1043_v19, 128 }
  0x22   :  { %953 = vmatmul.msk.f32.vlgmr.msrb.gmra.mxu3 %vm77_vm1, %v1342_v4 }
  0x2a   :  { %954 = vmatmul.msk.f32.gmra.mxu3 %vm77_vm1, %v1366_v16 }
  0x32   :  { %956 = vmatmul.msk.f32.vlgmr.msra.gmra.mxu3 %vm77_vm1, %v1342_v4 }
  0x3a   :  { %957 = vmatmul.msk.f32.gmra.mxu3 %vm77_vm1, %v1366_v16 }
  0x95   :  { %v114_v20 = vpop.f32.mrf.mxu3 }
  0x9d   :  { %v117_v21 = vpop.f32.mrf.mxu3 }
  0x9e   :  { %529 = vmatpush.msra.mxu2 %v117_v21 }
  0xa0   :  { %530 = vmatpush.msra.mxu2 %v114_v20 }
  0xa5   :  { %v137_v22 = vpop.f32.mrf.mxu3 }
  0xad   :  { %v140_v23 = vpop.f32.mrf.mxu3 }
  0xae   :  { %317 = vmatpush.msra.mxu0 %v140_v23 }
  0xb0   :  { %318 = vmatpush.msra.mxu0 %v137_v22 }
  0xb5   :  { %v160_v24 = vpop.f32.mrf.mxu3 }
  0xba   :  { %v1045_v25 = vpop.trf.xlu0 }
  0xbb   :  { %v1049_v26 = vunpack.i.h.bf16 %v1045_v25  ;;  %v1046_v27 = vunpack.i.l.bf16 %v1045_v25 }
  0xbd   :  { %965 = vmatmul.msk.f32.vlgmr.msra.gmra.mxu0 %vm254_vm6, %v1049_v26  ;;  %997 = vmatmul.msk.f32.vlgmr.msra.gmra.mxu2 %vm254_vm6, %v1046_v27  ;;  %v163_v28 = vpop.f32.mrf.mxu3 }
  0xbe   :  { %382 = vmatpush.msra.mxu1 %v163_v28 }
  0xc0   :  { %383 = vmatpush.msra.mxu1 %v160_v24 }
  0xc1   :  { %981 = vmatmul.msk.f32.vlgmr.msra.gmra.mxu1 %vm254_vm6, %v1049_v26 }
  0xc2   :  { %v1050_v29 = vpop.trf.xlu0 }
  0xc3   :  { %v1054_v30 = vunpack.i.h.bf16 %v1050_v29  ;;  %v1051_v31 = vunpack.i.l.bf16 %v1050_v29 }
  0xc5   :  { %966 = vmatmul.msk.f32.gmra.mxu0 %vm254_vm6, %v1054_v30  ;;  %998 = vmatmul.msk.f32.gmra.mxu2 %vm254_vm6, %v1051_v31 }
  0xc9   :  { %982 = vmatmul.msk.f32.gmra.mxu1 %vm254_vm6, %v1054_v30 }
  0xca   :  { %v1055_v32 = vpop.trf.xlu0 }
  0xcb   :  { %v1059_v33 = vunpack.i.h.bf16 %v1055_v32  ;;  %v1056_v34 = vunpack.i.l.bf16 %v1055_v32 }
  0xcd   :  { %967 = vmatmul.msk.f32.gmra.mxu0 %vm254_vm6, %v1059_v33  ;;  %999 = vmatmul.msk.f32.gmra.mxu2 %vm254_vm6, %v1056_v34 }
  0xd1   :  { %983 = vmatmul.msk.f32.gmra.mxu1 %vm254_vm6, %v1059_v33 }
  0xd2   :  { %v1060_v35 = vpop.trf.xlu0 }
  0xd3   :  { %v1064_v36 = vunpack.i.h.bf16 %v1060_v35  ;;  %v1061_v37 = vunpack.i.l.bf16 %v1060_v35 }
  0xd5   :  { %968 = vmatmul.msk.f32.gmra.mxu0 %vm254_vm6, %v1064_v36  ;;  %1000 = vmatmul.msk.f32.gmra.mxu2 %vm254_vm6, %v1061_v37 }
  0xd9   :  { %984 = vmatmul.msk.f32.gmra.mxu1 %vm254_vm6, %v1064_v36 }
  0xda   :  { %v1065_v38 = vpop.trf.xlu0 }
  0xdb   :  { %v1069_v39 = vunpack.i.h.bf16 %v1065_v38  ;;  %v1066_v40 = vunpack.i.l.bf16 %v1065_v38 }
  0xdd   :  { %969 = vmatmul.msk.f32.gmra.mxu0 %vm254_vm6, %v1069_v39  ;;  %1001 = vmatmul.msk.f32.gmra.mxu2 %vm254_vm6, %v1066_v40 }
  0xe1   :  { %985 = vmatmul.msk.f32.gmra.mxu1 %vm254_vm6, %v1069_v39 }
  0xe2   :  { %v1070_v41 = vpop.trf.xlu0 }
  0xe3   :  { %v1074_v42 = vunpack.i.h.bf16 %v1070_v41  ;;  %v1071_v43 = vunpack.i.l.bf16 %v1070_v41 }
  0xe5   :  { %970 = vmatmul.msk.f32.gmra.mxu0 %vm254_vm6, %v1074_v42  ;;  %1002 = vmatmul.msk.f32.gmra.mxu2 %vm254_vm6, %v1071_v43 }
  0xe9   :  { %986 = vmatmul.msk.f32.gmra.mxu1 %vm254_vm6, %v1074_v42 }
  0xea   :  { %v1075_v44 = vpop.trf.xlu0 }
  0xeb   :  { %v1079_v45 = vunpack.i.h.bf16 %v1075_v44  ;;  %v1076_v46 = vunpack.i.l.bf16 %v1075_v44 }
  0xed   :  { %971 = vmatmul.msk.f32.gmra.mxu0 %vm254_vm6, %v1079_v45  ;;  %1003 = vmatmul.msk.f32.gmra.mxu2 %vm254_vm6, %v1076_v46 }
  0xf1   :  { %987 = vmatmul.msk.f32.gmra.mxu1 %vm254_vm6, %v1079_v45 }
  0xf2   :  { %v1080_v47 = vpop.trf.xlu0 }
  0xf3   :  { %v1084_v48 = vunpack.i.h.bf16 %v1080_v47  ;;  %v1081_v49 = vunpack.i.l.bf16 %v1080_v47 }
  0xf5   :  { %972 = vmatmul.msk.f32.gmra.mxu0 %vm254_vm6, %v1084_v48  ;;  %1004 = vmatmul.msk.f32.gmra.mxu2 %vm254_vm6, %v1081_v49 }
  0xf9   :  { %988 = vmatmul.msk.f32.gmra.mxu1 %vm254_vm6, %v1084_v48 }
  0xfa   :  { %v1085_v50 = vpop.trf.xlu0 }
  0xfb   :  { %v1089_v51 = vunpack.i.h.bf16 %v1085_v50  ;;  %v1086_v52 = vunpack.i.l.bf16 %v1085_v50 }
  0xfd   :  { %973 = vmatmul.msk.f32.gmra.mxu0 %vm254_vm6, %v1089_v51  ;;  %1005 = vmatmul.msk.f32.gmra.mxu2 %vm254_vm6, %v1086_v52 }
 0x101   :  { %989 = vmatmul.msk.f32.gmra.mxu1 %vm254_vm6, %v1089_v51 }
 0x102   :  { %v1090_v53 = vpop.trf.xlu0 }
 0x103   :  { %v1094_v54 = vunpack.i.h.bf16 %v1090_v53  ;;  %v1091_v55 = vunpack.i.l.bf16 %v1090_v53 }
 0x105   :  { %974 = vmatmul.msk.f32.gmra.mxu0 %vm254_vm6, %v1094_v54  ;;  %1006 = vmatmul.msk.f32.gmra.mxu2 %vm254_vm6, %v1091_v55 }
 0x109   :  { %990 = vmatmul.msk.f32.gmra.mxu1 %vm254_vm6, %v1094_v54 }
 0x10a   :  { %v1095_v56 = vpop.trf.xlu0 }
 0x10b   :  { %v1099_v57 = vunpack.i.h.bf16 %v1095_v56  ;;  %v1096_v58 = vunpack.i.l.bf16 %v1095_v56 }
 0x10d   :  { %975 = vmatmul.msk.f32.gmra.mxu0 %vm254_vm6, %v1099_v57  ;;  %1007 = vmatmul.msk.f32.gmra.mxu2 %vm254_vm6, %v1096_v58 }
 0x111   :  { %991 = vmatmul.msk.f32.gmra.mxu1 %vm254_vm6, %v1099_v57 }
 0x112   :  { %v1100_v59 = vpop.trf.xlu0 }
 0x113   :  { %v1104_v60 = vunpack.i.h.bf16 %v1100_v59  ;;  %v1101_v61 = vunpack.i.l.bf16 %v1100_v59 }
 0x115   :  { %976 = vmatmul.msk.f32.gmra.mxu0 %vm254_vm6, %v1104_v60  ;;  %1008 = vmatmul.msk.f32.gmra.mxu2 %vm254_vm6, %v1101_v61 }
 0x119   :  { %992 = vmatmul.msk.f32.gmra.mxu1 %vm254_vm6, %v1104_v60 }
 0x11a   :  { %v1105_v62 = vpop.trf.xlu0 }
 0x11b   :  { %v1109_v63 = vunpack.i.h.bf16 %v1105_v62  ;;  %v1106_v0 = vunpack.i.l.bf16 %v1105_v62 }
 0x11d   :  { %977 = vmatmul.msk.f32.gmra.mxu0 %vm254_vm6, %v1109_v63  ;;  %1009 = vmatmul.msk.f32.gmra.mxu2 %vm254_vm6, %v1106_v0 }
 0x121   :  { %993 = vmatmul.msk.f32.gmra.mxu1 %vm254_vm6, %v1109_v63 }
 0x122   :  { %v1110_v2 = vpop.trf.xlu0 }
 0x123   :  { %v1114_v3 = vunpack.i.h.bf16 %v1110_v2  ;;  %v1111_v5 = vunpack.i.l.bf16 %v1110_v2 }
 0x125   :  { %978 = vmatmul.msk.f32.gmra.mxu0 %vm254_vm6, %v1114_v3  ;;  %1010 = vmatmul.msk.f32.gmra.mxu2 %vm254_vm6, %v1111_v5 }
 0x129   :  { %994 = vmatmul.msk.f32.gmra.mxu1 %vm254_vm6, %v1114_v3 }
 0x12a   :  { %v1115_v8 = vpop.trf.xlu0 }
 0x12b   :  { %v1119_v9 = vunpack.i.h.bf16 %v1115_v8  ;;  %v1116_v10 = vunpack.i.l.bf16 %v1115_v8 }
 0x12d   :  { %979 = vmatmul.msk.f32.gmra.mxu0 %vm254_vm6, %v1119_v9  ;;  %1011 = vmatmul.msk.f32.gmra.mxu2 %vm254_vm6, %v1116_v10 }
 0x131   :  { %995 = vmatmul.msk.f32.gmra.mxu1 %vm254_vm6, %v1119_v9 }
 0x132   :  { %v1120_v11 = vpop.trf.xlu0 }
 0x133   :  { %v1124_v12 = vunpack.i.h.bf16 %v1120_v11  ;;  %v1121_v13 = vunpack.i.l.bf16 %v1120_v11 }
 0x135   :  { %980 = vmatmul.msk.f32.gmra.mxu0 %vm254_vm6, %v1124_v12  ;;  %1012 = vmatmul.msk.f32.gmra.mxu2 %vm254_vm6, %v1121_v13 }
 0x139   :  { %996 = vmatmul.msk.f32.gmra.mxu1 %vm254_vm6, %v1124_v12 }
 0x13a   :  { %v320_v14 = vpop.f32.mrf.mxu0 }
 0x13e   :  { %v385_v15 = vpop.f32.mrf.mxu1 }
 0x140   :  { %v532_v17 = vpop.f32.mrf.mxu2 }
 0x141   :  { %v533_v18 = vadd.f32 %v532_v17, %v320_v14 }
 0x142   :  { %v323_v19 = vpop.f32.mrf.mxu0 }
 0x143   :  { %v1013_v20 = vmul.f32 -1.442695, %v533_v18 }
 0x145   :  { %1127 = vpow2.f32 %v1013_v20 }
 0x146   :  { %v1429_v22 = vpop.f32.mrf.mxu1 }
 0x148   :  { %v535_v21 = vpop.f32.mrf.mxu2 }
 0x149   :  { %v536_v23 = vadd.f32 %v535_v21, %v323_v19 }
 0x14a   :  { %v326_v24 = vpop.f32.mrf.mxu0 }
 0x14b   :  { %v1128_v25 = vpop.eup %1127  ;;  %v1014_v26 = vmul.f32 -1.442695, %v536_v23 }
 0x14c   :  { %v628_v27 = vadd.f32 1.0, %v1128_v25 }
 0x14d   :  { %1129 = vpow2.f32 %v1014_v26 }
 0x14e   :  { %1131 = vrcp.f32 %v628_v27  ;;  %v1431_v32 = vpop.f32.mrf.mxu1  ;;  %v655_v41 = vand.u32 2147483648, %v628_v27  ;;  %v653_v43 = vand.u32 2147483647, %v628_v27  ;;  %vm649_vm8 = vweird.f32 %v628_v27 }
 0x150   :  { %v538_v28 = vpop.f32.mrf.mxu2  ;;  %v656_v52 = vor.u32 1.1754944e-38, %v655_v41  ;;  %vm654_vm10 = vcmp.eq.f32.partialorder %v653_v43, 8.507059e+37 }
 0x151   :  { %v539_v29 = vadd.f32 %v538_v28, %v326_v24 }
 0x152   :  { %v329_v30 = vpop.f32.mrf.mxu0 }
 0x153   :  { %v1130_v31 = vpop.eup %1129  ;;  %v1015_v33 = vmul.f32 -1.442695, %v539_v29 }
 0x154   :  { %v1132_v34 = vpop.eup %1131  ;;  %v629_v35 = vadd.f32 1.0, %v1130_v31 }
 0x155   :  { %v645_v36 = vmul.f32 %v1132_v34, %v628_v27  ;;  %1133 = vpow2.f32 %v1015_v33  ;;  %vm650_vm7 = vweird.f32 %v1132_v34 }
 0x156   :  { %1135 = vrcp.f32 %v629_v35  ;;  %vm651_vm9 = vmor %vm649_vm8, %vm650_vm7  ;;  %v1433_v50 = vpop.f32.mrf.mxu1  ;;  %v670_v59 = vand.u32 2147483648, %v629_v35  ;;  %v668_v61 = vand.u32 2147483647, %v629_v35  ;;  %vm664_vm12 = vweird.f32 %v629_v35 }
 0x157   :  { %v646_v37 = vsub.f32 1.0, %v645_v36 }
 0x158   :  { %v541_v38 = vpop.f32.mrf.mxu2  ;;  %v671_v9 = vor.u32 1.1754944e-38, %v670_v59  ;;  %vm669_vm14 = vcmp.eq.f32.partialorder %v668_v61, 8.507059e+37 }
 0x159   :  { %v542_v39 = vadd.f32 %v541_v38, %v329_v30  ;;  %v647_v40 = vmul.f32 %v1132_v34, %v646_v37 }
 0x15a   :  { %v332_v42 = vpop.f32.mrf.mxu0 }
 0x15b   :  { %v1134_v44 = vpop.eup %1133  ;;  %v1016_v45 = vmul.f32 -1.442695, %v542_v39  ;;  %v648_v46 = vadd.f32 %v1132_v34, %v647_v40 }
 0x15c   :  { %v1136_v47 = vpop.eup %1135  ;;  %v630_v48 = vadd.f32 1.0, %v1134_v44 }
 0x15d   :  { %v660_v49 = vmul.f32 %v1136_v47, %v629_v35  ;;  %1137 = vpow2.f32 %v1016_v45  ;;  %v652_v51 = vsel %vm651_vm9, %v1132_v34, %v648_v46  ;;  %vm665_vm11 = vweird.f32 %v1136_v47 }
 0x15e   :  { %1139 = vrcp.f32 %v630_v48  ;;  %v657_v54 = vsel %vm654_vm10, %v656_v52, %v652_v51  ;;  %vm666_vm13 = vmor %vm664_vm12, %vm665_vm11  ;;  %v1437_v10 = vpop.f32.mrf.mxu1  ;;  %v685_v18 = vand.u32 2147483648, %v630_v48  ;;  %v683_v20 = vand.u32 2147483647, %v630_v48 }
 0x15f   :  { %v661_v53 = vsub.f32 1.0, %v660_v49  ;;  %v1435_v56 = vmul.f32 %v657_v54, %v385_v15  ;;  %vm679_vm2 = vweird.f32 %v630_v48 }
 0x160   :  { %v544_v55 = vpop.f32.mrf.mxu2  ;;  %v686_v29 = vor.u32 1.1754944e-38, %v685_v18  ;;  %vm684_vm6 = vcmp.eq.f32.partialorder %v683_v20, 8.507059e+37 }
 0x161   :  { %v545_v57 = vadd.f32 %v544_v55, %v332_v42  ;;  %v662_v58 = vmul.f32 %v1136_v47, %v661_v53 }
 0x162   :  { %v335_v60 = vpop.f32.mrf.mxu0 }
 0x163   :  { %v1138_v62 = vpop.eup %1137  ;;  %v1017_v63 = vmul.f32 -1.442695, %v545_v57  ;;  %v663_v0 = vadd.f32 %v1136_v47, %v662_v58 }
 0x164   :  { %v1140_v2 = vpop.eup %1139  ;;  %v631_v3 = vadd.f32 1.0, %v1138_v62 }
 0x165   :  { %v675_v5 = vmul.f32 %v1140_v2, %v630_v48  ;;  %1141 = vpow2.f32 %v1017_v63  ;;  %v667_v8 = vsel %vm666_vm13, %v1136_v47, %v663_v0  ;;  %vm680_vm15 = vweird.f32 %v1140_v2 }
 0x166   :  { %1143 = vrcp.f32 %v631_v3  ;;  %v672_v12 = vsel %vm669_vm14, %v671_v9, %v667_v8  ;;  %vm681_vm4 = vmor %vm679_vm2, %vm680_vm15  ;;  %v1445_v34 = vpop.f32.mrf.mxu1  ;;  %v700_v37 = vand.u32 2147483648, %v631_v3  ;;  %v698_v39 = vand.u32 2147483647, %v631_v3 }
 0x167   :  { %v676_v11 = vsub.f32 1.0, %v675_v5  ;;  %v1440_v14 = vmul.f32 %v672_v12, %v1429_v22  ;;  %vm694_vm8 = vweird.f32 %v631_v3 }
 0x168   :  { %v547_v13 = vpop.f32.mrf.mxu2  ;;  %vm699_vm10 = vcmp.eq.f32.partialorder %v698_v39, 8.507059e+37 }
 0x169   :  { %v548_v15 = vadd.f32 %v547_v13, %v335_v60  ;;  %v677_v17 = vmul.f32 %v1140_v2, %v676_v11 }
 0x16a   :  { %v338_v19 = vpop.f32.mrf.mxu0 }
 0x16b   :  { %v1142_v21 = vpop.eup %1141  ;;  %v1018_v23 = vmul.f32 -1.442695, %v548_v15  ;;  %v678_v24 = vadd.f32 %v1140_v2, %v677_v17 }
 0x16c   :  { %v1144_v25 = vpop.eup %1143  ;;  %v632_v26 = vadd.f32 1.0, %v1142_v21 }
 0x16d   :  { %v690_v27 = vmul.f32 %v1144_v25, %v631_v3  ;;  %1145 = vpow2.f32 %v1018_v23  ;;  %v682_v28 = vsel %vm681_vm4, %v1140_v2, %v678_v24  ;;  %vm695_vm7 = vweird.f32 %v1144_v25 }
 0x16e   :  { %1147 = vrcp.f32 %v632_v26  ;;  %v687_v30 = vsel %vm684_vm6, %v686_v29, %v682_v28  ;;  %vm696_vm9 = vmor %vm694_vm8, %vm695_vm7  ;;  %v715_v54 = vand.u32 2147483648, %v632_v26  ;;  %v713_v57 = vand.u32 2147483647, %v632_v26  ;;  %v403_v59 = vpop.f32.mrf.mxu1 }
 0x16f   :  { %v691_v22 = vsub.f32 1.0, %v690_v27  ;;  %v1443_v33 = vmul.f32 %v687_v30, %v1431_v32  ;;  %v701_v32 = vor.u32 1.1754944e-38, %v700_v37  ;;  %vm709_vm12 = vweird.f32 %v632_v26 }
 0x170   :  { %v550_v31 = vpop.f32.mrf.mxu2  ;;  %v716_v3 = vor.u32 1.1754944e-38, %v715_v54  ;;  %vm714_vm14 = vcmp.eq.f32.partialorder %v713_v57, 8.507059e+37 }
 0x171   :  { %v551_v35 = vadd.f32 %v550_v31, %v338_v19  ;;  %v692_v36 = vmul.f32 %v1144_v25, %v691_v22 }
 0x172   :  { %v341_v38 = vpop.f32.mrf.mxu0 }
 0x173   :  { %v1146_v40 = vpop.eup %1145  ;;  %v1019_v41 = vmul.f32 -1.442695, %v551_v35  ;;  %v693_v42 = vadd.f32 %v1144_v25, %v692_v36 }
 0x174   :  { %v1148_v43 = vpop.eup %1147  ;;  %v633_v44 = vadd.f32 1.0, %v1146_v40 }
 0x175   :  { %v705_v45 = vmul.f32 %v1148_v43, %v632_v26  ;;  %1149 = vpow2.f32 %v1019_v41  ;;  %v697_v46 = vsel %vm696_vm9, %v1144_v25, %v693_v42  ;;  %vm710_vm11 = vweird.f32 %v1148_v43 }
 0x176   :  { %1151 = vrcp.f32 %v633_v44  ;;  %v702_v48 = vsel %vm699_vm10, %v701_v32, %v697_v46  ;;  %vm711_vm13 = vmor %vm709_vm12, %vm710_vm11  ;;  %v730_v13 = vand.u32 2147483648, %v633_v44  ;;  %v728_v17 = vand.u32 2147483647, %v633_v44  ;;  %v406_v25 = vpop.f32.mrf.mxu1 }
 0x177   :  { %v706_v47 = vsub.f32 1.0, %v705_v45  ;;  %v1448_v51 = vmul.f32 %v702_v48, %v1433_v50  ;;  %vm724_vm2 = vweird.f32 %v633_v44 }
 0x178   :  { %v553_v49 = vpop.f32.mrf.mxu2  ;;  %vm729_vm6 = vcmp.eq.f32.partialorder %v728_v17, 8.507059e+37 }
 0x179   :  { %v554_v52 = vadd.f32 %v553_v49, %v341_v38  ;;  %v707_v53 = vmul.f32 %v1148_v43, %v706_v47 }
 0x17a   :  { %v344_v55 = vpop.f32.mrf.mxu0 }
 0x17b   :  { %v1150_v58 = vpop.eup %1149  ;;  %v1020_v60 = vmul.f32 -1.442695, %v554_v52  ;;  %v708_v61 = vadd.f32 %v1148_v43, %v707_v53 }
 0x17c   :  { %v1152_v62 = vpop.eup %1151  ;;  %v634_v63 = vadd.f32 1.0, %v1150_v58 }
 0x17d   :  { %v720_v0 = vmul.f32 %v1152_v62, %v633_v44  ;;  %1153 = vpow2.f32 %v1020_v60  ;;  %v712_v2 = vsel %vm711_vm13, %v1148_v43, %v708_v61  ;;  %vm725_vm15 = vweird.f32 %v1152_v62 }
 0x17e   :  { %1155 = vrcp.f32 %v634_v63  ;;  %v717_v5 = vsel %vm714_vm14, %v716_v3, %v712_v2  ;;  %vm726_vm4 = vmor %vm724_vm2, %vm725_vm15  ;;  %v745_v31 = vand.u32 2147483648, %v634_v63  ;;  %v743_v36 = vand.u32 2147483647, %v634_v63  ;;  %v409_v44 = vpop.f32.mrf.mxu1 }
 0x17f   :  { %v721_v50 = vsub.f32 1.0, %v720_v0  ;;  %v1451_v9 = vmul.f32 %v717_v5, %v1437_v10  ;;  %v731_v10 = vor.u32 1.1754944e-38, %v730_v13  ;;  %vm739_vm8 = vweird.f32 %v634_v63 }
 0x180   :  { %v556_v8 = vpop.f32.mrf.mxu2  ;;  %v746_v43 = vor.u32 1.1754944e-38, %v745_v31  ;;  %vm744_vm10 = vcmp.eq.f32.partialorder %v743_v36, 8.507059e+37 }
 0x181   :  { %v557_v11 = vadd.f32 %v556_v8, %v344_v55  ;;  %v722_v12 = vmul.f32 %v1152_v62, %v721_v50 }
 0x182   :  { %v1453_v15 = vpop.f32.mrf.mxu0 }
 0x183   :  { %v1154_v18 = vpop.eup %1153  ;;  %v1021_v19 = vmul.f32 -1.442695, %v557_v11  ;;  %v723_v20 = vadd.f32 %v1152_v62, %v722_v12 }
 0x184   :  { %v1156_v21 = vpop.eup %1155  ;;  %v635_v23 = vadd.f32 1.0, %v1154_v18 }
 0x185   :  { %v735_v24 = vmul.f32 %v1156_v21, %v634_v63  ;;  %1157 = vpow2.f32 %v1021_v19  ;;  %v727_v26 = vsel %vm726_vm4, %v1152_v62, %v723_v20  ;;  %vm740_vm7 = vweird.f32 %v1156_v21 }
 0x186   :  { %1159 = vrcp.f32 %v635_v23  ;;  %v732_v28 = vsel %vm729_vm6, %v731_v10, %v727_v26  ;;  %vm741_vm9 = vmor %vm739_vm8, %vm740_vm7  ;;  %v760_v48 = vand.u32 2147483648, %v635_v23  ;;  %v758_v52 = vand.u32 2147483647, %v635_v23 }
 0x187   :  { %v736_v27 = vsub.f32 1.0, %v735_v24  ;;  %v1456_v22 = vmul.f32 %v732_v28, %v1445_v34  ;;  %vm754_vm12 = vweird.f32 %v635_v23 }
 0x188   :  { %v559_v29 = vpop.f32.mrf.mxu2  ;;  %v761_v58 = vor.u32 1.1754944e-38, %v760_v48  ;;  %vm759_vm14 = vcmp.eq.f32.partialorder %v758_v52, 8.507059e+37 }
 0x189   :  { %v737_v30 = vmul.f32 %v1156_v21, %v736_v27  ;;  %v560_v18 = vadd.f32 %v559_v29, %v1453_v15  ;;  %v76_v29 = vld [vmem:[#allocation8 + $0x38] sm:$0x1] }
 0x18a   :  { %v350_v35 = vpop.f32.mrf.mxu0  ;;  %958 = vmatpush.msk.msrb.mxu3 %vm84_vm0, %v76_v29 }
 0x18b   :  { %v1158_v37 = vpop.eup %1157  ;;  %v738_v38 = vadd.f32 %v1156_v21, %v737_v30 }
 0x18c   :  { %v1160_v39 = vpop.eup %1159  ;;  %v636_v40 = vadd.f32 1.0, %v1158_v37 }
 0x18d   :  { %v750_v41 = vmul.f32 %v1160_v39, %v635_v23  ;;  %v742_v42 = vsel %vm741_vm9, %v1156_v21, %v738_v38  ;;  %vm755_vm11 = vweird.f32 %v1160_v39 }
 0x18e   :  { %1161 = vrcp.f32 %v636_v40  ;;  %v747_v34 = vsel %vm744_vm10, %v746_v43, %v742_v42  ;;  %vm756_vm13 = vmor %vm754_vm12, %vm755_vm11  ;;  %v775_v2 = vand.u32 2147483648, %v636_v40  ;;  %v773_v50 = vand.u32 2147483647, %v636_v40 }
 0x18f   :  { %v751_v45 = vsub.f32 1.0, %v750_v41  ;;  %v1458_v32 = vmul.f32 %v747_v34, %v403_v59  ;;  %v1462_v59 = vpop.f32.mrf.mxu1  ;;  %vm769_vm2 = vweird.f32 %v636_v40 }
 0x190   :  { %v562_v46 = vpop.f32.mrf.mxu2  ;;  %v776_v11 = vor.u32 1.1754944e-38, %v775_v2  ;;  %vm774_vm6 = vcmp.eq.f32.partialorder %v773_v50, 8.507059e+37 }
 0x191   :  { %v752_v47 = vmul.f32 %v1160_v39, %v751_v45  ;;  %v563_v20 = vadd.f32 %v562_v46, %v350_v35  ;;  %v72_v35 = vld [vmem:[#allocation8 + $0x18] sm:$0xff] }
 0x192   :  { %v353_v49 = vpop.f32.mrf.mxu0  ;;  %181 = vmatpush.msrb.mxu3 %v72_v35 }
 0x193   :  { %v753_v53 = vadd.f32 %v1160_v39, %v752_v47  ;;  %v1023_v26 = vmul.f32 -1.442695, %v563_v20  ;;  %959 = vmatmul.msk.f32.vlgmr.msrb.gmra.mxu3 %vm77_vm1, %v1342_v4 }
 0x194   :  { %v1162_v54 = vpop.eup %1161 }
 0x195   :  { %v765_v55 = vmul.f32 %v1162_v54, %v636_v40  ;;  %v757_v57 = vsel %vm756_vm13, %v1160_v39, %v753_v53  ;;  %vm770_vm15 = vweird.f32 %v1162_v54 }
 0x196   :  { %v762_v61 = vsel %vm759_vm14, %v761_v58, %v757_v57  ;;  %vm771_vm4 = vmor %vm769_vm2, %vm770_vm15 }
 0x197   :  { %v766_v60 = vsub.f32 1.0, %v765_v55  ;;  %v1460_v63 = vmul.f32 %v762_v61, %v406_v25  ;;  %v1467_v19 = vpop.f32.mrf.mxu1  ;;  %v1022_v25 = vmul.f32 -1.442695, %v560_v18 }
 0x198   :  { %v565_v62 = vpop.f32.mrf.mxu2 }
 0x199   :  { %v767_v0 = vmul.f32 %v1162_v54, %v766_v60  ;;  %v566_v23 = vadd.f32 %v565_v62, %v353_v49  ;;  %1163 = vpow2.f32 %v1022_v25 }
 0x19a   :  { %v356_v3 = vpop.f32.mrf.mxu0  ;;  %1165 = vpow2.f32 %v1023_v26 }
 0x19b   :  { %v768_v5 = vadd.f32 %v1162_v54, %v767_v0  ;;  %v1024_v27 = vmul.f32 -1.442695, %v566_v23  ;;  %960 = vmatmul.msk.f32.gmra.mxu3 %vm77_vm1, %v1366_v16 }
 0x19d   :  { %v772_v8 = vsel %vm771_vm4, %v1162_v54, %v768_v5  ;;  %1167 = vpow2.f32 %v1024_v27 }
 0x19e   :  { %v777_v12 = vsel %vm774_vm6, %v776_v11, %v772_v8 }
 0x19f   :  { %v1464_v17 = vmul.f32 %v777_v12, %v409_v44  ;;  %v1469_v36 = vpop.f32.mrf.mxu1  ;;  %v1164_v38 = vpop.eup %1163 }
 0x1a0   :  { %v568_v13 = vpop.f32.mrf.mxu2  ;;  %v1166_v40 = vpop.eup %1165  ;;  %v1474_v44 = vadd.f32 1.0, %v1164_v38 }
 0x1a1   :  { %v569_v24 = vadd.f32 %v568_v13, %v356_v3  ;;  %v1476_v34 = vadd.f32 1.0, %v1166_v40 }
 0x1a2   :  { %v359_v21 = vpop.f32.mrf.mxu0 }
 0x1a3   :  { %v1025_v30 = vmul.f32 -1.442695, %v569_v24  ;;  %v1168_v41 = vpop.eup %1167  ;;  %vm799_vm13 = vweird.f32 %v1476_v34 }
 0x1a4   :  { %v1478_v46 = vadd.f32 1.0, %v1168_v41 }
 0x1a5   :  { %1169 = vpow2.f32 %v1025_v30 }
 0x1a6   :  { %v818_v30 = vand.u32 2147483647, %v1478_v46  ;;  %vm814_vm9 = vweird.f32 %v1478_v46 }
 0x1a7   :  { %v1480_v47 = vpop.f32.mrf.mxu1 }
 0x1a8   :  { %v571_v10 = vpop.f32.mrf.mxu2 }
 0x1a9   :  { %v572_v28 = vadd.f32 %v571_v10, %v359_v21 }
 0x1aa   :  { %v362_v15 = vpop.f32.mrf.mxu0 }
 0x1ab   :  { %v1026_v31 = vmul.f32 -1.442695, %v572_v28  ;;  %v1170_v43 = vpop.eup %1169 }
 0x1ac   :  { %v1482_v48 = vadd.f32 1.0, %v1170_v43 }
 0x1ad   :  { %1171 = vpow2.f32 %v1026_v31 }
 0x1ae   :  { %vm829_vm1 = vweird.f32 %v1482_v48  ;;  %v833_v38 = vand.u32 2147483647, %v1482_v48 }
 0x1af   :  { %v1506_v2 = vpop.f32.mrf.mxu1 }
 0x1b0   :  { %v574_v37 = vpop.f32.mrf.mxu2 }
 0x1b1   :  { %v575_v39 = vadd.f32 %v574_v37, %v362_v15 }
 0x1b2   :  { %v365_v52 = vpop.f32.mrf.mxu0 }
 0x1b3   :  { %v1027_v42 = vmul.f32 -1.442695, %v575_v39  ;;  %v1172_v45 = vpop.eup %1171 }
 0x1b4   :  { %v1485_v49 = vadd.f32 1.0, %v1172_v45 }
 0x1b5   :  { %1173 = vpow2.f32 %v1027_v42 }
 0x1b6   :  { %1175 = vrcp.f32 %v1474_v44  ;;  %vm844_vm2 = vweird.f32 %v1485_v49 }
 0x1b7   :  { %1177 = vrcp.f32 %v1476_v34  ;;  %v427_v28 = vpop.f32.mrf.mxu1 }
 0x1b8   :  { %v577_v53 = vpop.f32.mrf.mxu2  ;;  %1179 = vrcp.f32 %v1478_v46 }
 0x1b9   :  { %v578_v4 = vadd.f32 %v577_v53, %v365_v52  ;;  %1181 = vrcp.f32 %v1482_v48 }
 0x1ba   :  { %1183 = vrcp.f32 %v1485_v49 }
 0x1bb   :  { %v1174_v54 = vpop.eup %1173  ;;  %v1028_v55 = vmul.f32 -1.442695, %v578_v4 }
 0x1bc   :  { %v1493_v57 = vadd.f32 1.0, %v1174_v54  ;;  %v1495_v58 = vpop.eup %1175 }
 0x1bd   :  { %1185 = vpow2.f32 %v1028_v55  ;;  %v1498_v60 = vpop.eup %1177  ;;  %v780_v50 = vmul.f32 %v1495_v58, %v1474_v44  ;;  %vm785_vm14 = vweird.f32 %v1495_v58  ;;  %v848_v55 = vand.u32 2147483647, %v1485_v49 }
 0x1be   :  { %1187 = vrcp.f32 %v1493_v57  ;;  %v1500_v61 = vpop.eup %1179  ;;  %v795_v8 = vmul.f32 %v1498_v60, %v1476_v34  ;;  %vm800_vm10 = vweird.f32 %v1498_v60  ;;  %vm859_vm11 = vweird.f32 %v1493_v57 }
 0x1bf   :  { %v1502_v62 = vpop.eup %1181  ;;  %v810_v13 = vmul.f32 %v1500_v61, %v1478_v46  ;;  %v781_v21 = vsub.f32 1.0, %v780_v50  ;;  %vm815_vm0 = vweird.f32 %v1500_v61  ;;  %v863_v43 = vand.u32 2147483647, %v1493_v57 }
 0x1c0   :  { %v1504_v0 = vpop.eup %1183  ;;  %v825_v18 = vmul.f32 %v1502_v62, %v1482_v48  ;;  %v796_v24 = vsub.f32 1.0, %v795_v8  ;;  %v865_v45 = vand.u32 2147483648, %v1493_v57  ;;  %vm830_vm4 = vweird.f32 %v1502_v62 }
 0x1c1   :  { %v840_v11 = vmul.f32 %v1504_v0, %v1485_v49  ;;  %v811_v26 = vsub.f32 1.0, %v810_v13  ;;  %v1525_v31 = vmul.f32 %v1495_v58, %v781_v21  ;;  %vm845_vm8 = vweird.f32 %v1504_v0 }
 0x1c2   :  { %v826_v25 = vsub.f32 1.0, %v825_v18  ;;  %v797_v35 = vmul.f32 %v1498_v60, %v796_v24  ;;  %v835_v13 = vand.u32 2147483648, %v1482_v48  ;;  %vm864_vm3 = vcmp.eq.f32.partialorder %v863_v43, 8.507059e+37 }
 0x1c3   :  { %v1186_v16 = vpop.eup %1185  ;;  %v841_v23 = vsub.f32 1.0, %v840_v11  ;;  %v812_v39 = vmul.f32 %v1500_v61, %v811_v26  ;;  %v820_v26 = vand.u32 2147483648, %v1478_v46 }
 0x1c4   :  { %v1508_v3 = vpop.eup %1187  ;;  %v643_v5 = vadd.f32 1.0, %v1186_v16  ;;  %v827_v37 = vmul.f32 %v1502_v62, %v826_v25  ;;  %v850_v16 = vand.u32 2147483648, %v1485_v49  ;;  %v866_v49 = vor.u32 1.1754944e-38, %v865_v45 }
 0x1c5   :  { %v855_v12 = vmul.f32 %v1508_v3, %v1493_v57  ;;  %v842_v29 = vmul.f32 %v1504_v0, %v841_v23  ;;  %vm860_vm7 = vweird.f32 %v1508_v3 }
 0x1c6   :  { %1189 = vrcp.f32 %v643_v5  ;;  %v880_v42 = vand.u32 2147483648, %v643_v5  ;;  %v878_v53 = vand.u32 2147483647, %v643_v5  ;;  %vm1545_vm15 = vmor %vm859_vm11, %vm860_vm7  ;;  %vm874_vm6 = vweird.f32 %v643_v5 }
 0x1c7   :  { %v856_v20 = vsub.f32 1.0, %v855_v12  ;;  %v843_v4 = vadd.f32 %v1504_v0, %v842_v29  ;;  %vm1558_vm7 = vmor %vm844_vm2, %vm845_vm8  ;;  %v828_v11 = vadd.f32 %v1502_v62, %v827_v37  ;;  %v851_v24 = vor.u32 1.1754944e-38, %v850_v16 }
 0x1c8   :  { %v881_v12 = vor.u32 1.1754944e-38, %v880_v42  ;;  %vm879_vm5 = vcmp.eq.f32.partialorder %v878_v53, 8.507059e+37  ;;  %vm1573_vm8 = vmor %vm829_vm1, %vm830_vm4  ;;  %v836_v29 = vor.u32 1.1754944e-38, %v835_v13  ;;  %v803_v37 = vand.u32 2147483647, %v1476_v34 }
 0x1c9   :  { %v857_v10 = vmul.f32 %v1508_v3, %v856_v20  ;;  %v430_v20 = vpop.f32.mrf.mxu1  ;;  %v821_v42 = vor.u32 1.1754944e-38, %v820_v26  ;;  %vm784_vm1 = vweird.f32 %v1474_v44  ;;  %vm1660_vm2 = vcmp.eq.s32.totalorder %v1351_v7, %v1348_v6 }
 0x1cb   :  { %v858_v41 = vadd.f32 %v1508_v3, %v857_v10 }
 0x1cc   :  { %v1190_v27 = vpop.eup %1189 }
 0x1cd   :  { %v870_v15 = vmul.f32 %v1190_v27, %v643_v5  ;;  %vm875_vm12 = vweird.f32 %v1190_v27  ;;  %v862_v50 = vsel %vm1545_vm15, %v1508_v3, %v858_v41  ;;  %v813_v5 = vadd.f32 %v1500_v61, %v812_v39 }
 0x1ce   :  { %vm876_vm11 = vmor %vm874_vm6, %vm875_vm12  ;;  %v847_v3 = vsel %vm1558_vm7, %v1504_v0, %v843_v4  ;;  %v867_v23 = vsel %vm864_vm3, %v866_v49, %v862_v50  ;;  %vm849_vm12 = vcmp.eq.f32.partialorder %v848_v55, 8.507059e+37  ;;  %v832_v0 = vsel %vm1573_vm8, %v1502_v62, %v828_v11 }
 0x1cf   :  { %v871_v40 = vsub.f32 1.0, %v870_v15  ;;  %v852_v15 = vsel %vm849_vm12, %v851_v24, %v847_v3  ;;  %vm1586_vm3 = vmor %vm814_vm9, %vm815_vm0  ;;  %v805_v39 = vand.u32 2147483648, %v1476_v34  ;;  %vm819_vm9 = vcmp.eq.f32.partialorder %v818_v30, 8.507059e+37 }
 0x1d0   :  { %v817_v62 = vsel %vm1586_vm3, %v1500_v61, %v813_v5  ;;  %vm1601_vm0 = vmor %vm799_vm13, %vm800_vm10  ;;  %v897_v61 = vmul.f32 %v852_v15, %v1506_v2  ;;  %v788_v34 = vand.u32 2147483647, %v1474_v44  ;;  %vm804_vm13 = vcmp.eq.f32.partialorder %v803_v37, 8.507059e+37 }
 0x1d1   :  { %v872_v52 = vmul.f32 %v1190_v27, %v871_v40  ;;  %v898_v40 = vmul.f32 %v867_v23, %v427_v28  ;;  %v790_v28 = vand.u32 2147483648, %v1474_v44  ;;  %v806_v45 = vor.u32 1.1754944e-38, %v805_v39  ;;  %vm786_vm10 = vmor %vm784_vm1, %vm785_vm14 }
 0x1d2   :  { %vm789_vm15 = vcmp.eq.f32.partialorder %v788_v34, 8.507059e+37  ;;  %vm1659_vm14 = vcmp.eq.s32.totalorder %v1340_v1, %v1348_v6 }
 0x1d3   :  { %v873_v57 = vadd.f32 %v1190_v27, %v872_v52  ;;  %v791_v46 = vor.u32 1.1754944e-38, %v790_v28 }
 0x1d5   :  { %v877_v18 = vsel %vm876_vm11, %v1190_v27, %v873_v57  ;;  %v798_v27 = vadd.f32 %v1498_v60, %v797_v35  ;;  %v783_v35 = vadd.f32 %v1495_v58, %v1525_v31 }
 0x1d6   :  { %v882_v21 = vsel %vm879_vm5, %v881_v12, %v877_v18  ;;  %vm834_vm5 = vcmp.eq.f32.partialorder %v833_v38, 8.507059e+37  ;;  %v822_v38 = vsel %vm819_vm9, %v821_v42, %v817_v62 }
 0x1d7   :  { %v899_v10 = vmul.f32 %v882_v21, %v430_v20  ;;  %v837_v41 = vsel %vm834_vm5, %v836_v29, %v832_v0  ;;  %v802_v31 = vsel %vm1601_vm0, %v1498_v60, %v798_v27  ;;  %v787_v2 = vsel %vm786_vm10, %v1495_v58, %v783_v35 }
 0x1d8   :  { %v896_v52 = vmul.f32 %v837_v41, %v1480_v47  ;;  %v807_v53 = vsel %vm804_vm13, %v806_v45, %v802_v31  ;;  %v895_v30 = vmul.f32 %v822_v38, %v1469_v36  ;;  %v792_v60 = vsel %vm789_vm15, %v791_v46, %v787_v2 }
 0x1d9   :  { %902 = vmatpush.msra.mxu3 %v899_v10  ;;  %v894_v44 = vmul.f32 %v807_v53, %v1467_v19  ;;  %v893_v4 = vmul.f32 %v792_v60, %v1462_v59  ;;  %v1301_v59 = vmov 1.0  }
 0x1db   :  { %903 = vmatpush.msra.mxu3 %v898_v40 }
 0x1dd   :  { %904 = vmatpush.msra.mxu3 %v897_v61 }
 0x1df   :  { %905 = vmatpush.msra.mxu3 %v896_v52 }
 0x1e1   :  { %906 = vmatpush.msra.mxu3 %v895_v30 }
 0x1e3   :  { %907 = vmatpush.msra.mxu3 %v894_v44 }
 0x1e5   :  { %908 = vmatpush.msra.mxu3 %v893_v4 }
 0x1e7   :  { %909 = vmatpush.msra.mxu3 %v1464_v17 }
 0x1e9   :  { %910 = vmatpush.msra.mxu3 %v1460_v63 }
 0x1eb   :  { %911 = vmatpush.msra.mxu3 %v1458_v32 }
 0x1ed   :  { %912 = vmatpush.msra.mxu3 %v1456_v22 }
 0x1ef   :  { %913 = vmatpush.msra.mxu3 %v1451_v9 }
 0x1f1   :  { %914 = vmatpush.msra.mxu3 %v1448_v51 }
 0x1f3   :  { %915 = vmatpush.msra.mxu3 %v1443_v33 }
 0x1f5   :  { %916 = vmatpush.msra.mxu3 %v1440_v14 }
 0x1f7   :  { %917 = vmatpush.msra.mxu3 %v1435_v56 }
 0x1f8   :  { %1029 = vmatmul.msk.f32.vlgmr.msra.gmra.mxu3 %vm1659_vm14, %v1301_v59 }
 0x200   :  { %1030 = vmatmul.msk.f32.gmra.mxu3 %vm1660_vm2, %v1301_v59 }
 0x216   :  { %v183_v22 = vpop.f32.mrf.mxu3 }
 0x21e   :  { %v186_v32 = vpop.f32.mrf.mxu3 }
 0x27b   :  { %v919_v9 = vpop.f32.mrf.mxu3 }
 0x27c   :  { %v925_v63 = vadd.f32 %v919_v9, %v183_v22 }
 0x27e   :  { %927 = vst [vmem:[#allocation9] sm:$0xff] %v925_v63 }
 0x283   :  { %v922_v56 = vpop.f32.mrf.mxu3 }
 0x284   :  { %v926_v14 = vadd.f32 %v922_v56, %v186_v32 }
 0x286   :  { %928 = vst [vmem:[#allocation9 + $0x8] sm:$0xff] %v926_v14 }
 0x287   :  { %941 = dma.vmem_to_hbm [thread:$0]  %s934_s7, 256, %s936_s10, [#allocation5], %s1295_s25, %s1295_s25, %s1296_s26  }
 0x288   :  { %1291 = dma.done.wait [#allocation5], 256  }
 0x289   :  { %1292 = vsyncadd [#allocation5], 4294967040 }
 0x28a   :  { %946 = vsyncpa [#allocation4], 1 }
 0x28b   :  { %947 = vsyncpa [#allocation7], 1 }
 0x28c   :  { %948 = vsyncpa [#allocation5], 1 }

</bundles_post_ra>
